<compile_context>
chip_gen: v7x
topology: tpu7x:2x2x1
jax: 0.10.0
libtpu: 0.0.40
codegen_flags: <defaults>
</compile_context>

<pallas_src>
import jax
import jax.numpy as jnp
from jax.experimental import pallas as pl
from jax.experimental.pallas import tpu as pltpu

IMG_LEN = 1024
TXT_LEN = 300
N_CLASSES = 50
N_PAD = 128          # lane-dense padded class dimension (exactly one vreg wide)
BATCH_TILE = 1024    # sweepable 1024-2048; ~12 MiB double-buffered VMEM at 1024


def _fc_logsoftmax_kernel(img_ref, txt_ref, w_img_ref, w_txt_ref, b_ref, o_ref):
    # img_ref: (TB, IMG_LEN) f32, txt_ref: (TB, TXT_LEN) f32
    # w_img_ref: (IMG_LEN, N_PAD) bf16, w_txt_ref: (TXT_LEN, N_PAD) bf16
    # b_ref: (1, N_PAD) f32 (padded lanes = -inf), o_ref: (TB, N_PAD) f32

    # f32 activations were read once from HBM; cast to bf16 on-chip (VPU slack).
    img = img_ref[...].astype(jnp.bfloat16)
    txt = txt_ref[...].astype(jnp.bfloat16)

    # Linear(1324 -> 50) with the concat fused away: two bf16 MXU matmuls,
    # f32 accumulation.  Padded class columns have zero weights.
    logits = jnp.dot(img, w_img_ref[...], preferred_element_type=jnp.float32)
    logits = logits + jnp.dot(txt, w_txt_ref[...], preferred_element_type=jnp.float32)
    # Bias carries -inf in the padded lanes, so they drop out of max/sum exactly.
    logits = logits + b_ref[...]

    # Numerically-stable log_softmax along the class (lane) axis, all in f32.
    m = jnp.max(logits, axis=-1, keepdims=True)
    shifted = logits - m
    lse = jnp.log(jnp.sum(jnp.exp(shifted), axis=-1, keepdims=True))
    o_ref[...] = shifted - lse


def prepare_params(w_t, b):
    """Linear params (w_t: (1324, 50) f32, b: (50,) f32) -> kernel layout:
    image/text row split, classes zero-padded to 128 (bias padded with -inf),
    bf16 weights, f32 bias."""
    w_pad = jnp.zeros((IMG_LEN + TXT_LEN, N_PAD), jnp.float32).at[:, :N_CLASSES].set(w_t)
    w_img = w_pad[:IMG_LEN].astype(jnp.bfloat16)
    w_txt = w_pad[IMG_LEN:].astype(jnp.bfloat16)
    b_pad = jnp.full((1, N_PAD), -jnp.inf, jnp.float32).at[0, :N_CLASSES].set(b)
    return w_img, w_txt, b_pad


def _choose_batch_tile(B, batch_tile):
    if B <= 8:
        return B                      # single full-array block (tiny batch)
    if B >= 2 * batch_tile:
        return batch_tile
    # Split mid-size batches into >=2 multiple-of-8 tiles so both v7x TCs work.
    half = pl.cdiv(B, 2)
    return min(batch_tile, ((half + 7) // 8) * 8)


def _act_spec(shape, index_map, n_steps):
    # Triple-buffer the activation streams on long grids (hides DMA-issue
    # latency; most valuable on v7x).  Guarded so older JAX still constructs.
    if n_steps >= 3 and hasattr(pl, "Buffered"):
        try:
            return pl.BlockSpec(shape, index_map, pipeline_mode=pl.Buffered(3))
        except TypeError:
            pass
    return pl.BlockSpec(shape, index_map)


def extreme_trivial_forward(inp_img, inp_txt, w_img, w_txt, b_pad,
                            *, batch_tile=BATCH_TILE):
    """inp_img: (B, IMG_LEN) f32, inp_txt: (B, TXT_LEN) f32; params from prepare_params."""
    B = inp_img.shape[0]
    tb = _choose_batch_tile(B, batch_tile)
    n_steps = pl.cdiv(B, tb)          # ragged last block handled by Pallas writeback

    cost = pl.CostEstimate(
        flops=2 * B * (IMG_LEN + TXT_LEN) * N_CLASSES,
        transcendentals=2 * B * N_CLASSES,                        # exp + log
        bytes_accessed=(B * IMG_LEN * 4 + B * TXT_LEN * 4 +       # f32 activations
                        (IMG_LEN + TXT_LEN) * N_PAD * 2 +         # bf16 weights
                        N_PAD * 4 + B * N_PAD * 4),               # bias + f32 output
    )

    out = pl.pallas_call(
        _fc_logsoftmax_kernel,
        out_shape=jax.ShapeDtypeStruct((B, N_PAD), jnp.float32),
        grid=(n_steps,),
        in_specs=[
            _act_spec((tb, IMG_LEN), lambda i: (i, 0), n_steps),
            _act_spec((tb, TXT_LEN), lambda i: (i, 0), n_steps),
            pl.BlockSpec((IMG_LEN, N_PAD), lambda i: (0, 0)),     # VMEM-resident
            pl.BlockSpec((TXT_LEN, N_PAD), lambda i: (0, 0)),     # VMEM-resident
            pl.BlockSpec((1, N_PAD), lambda i: (0, 0)),           # VMEM-resident
        ],
        out_specs=pl.BlockSpec((tb, N_PAD), lambda i: (i, 0)),
        compiler_params=pltpu.CompilerParams(
            dimension_semantics=("parallel",),                    # v7x: 2 TCs share batch
            vmem_limit_bytes=32 << 20),
        cost_estimate=cost,
    )(inp_img, inp_txt, w_img, w_txt, b_pad)

    # Only the class dim is trimmed; padded lanes hold -inf by construction.
    # Downstream that can consume the (B, 128) padded buffer should skip this.
    return out[:, :N_CLASSES]


def init_params(key):
    # Mimic nn.Linear init: U(-1/sqrt(fan_in), 1/sqrt(fan_in)), deterministic.
    fan_in = IMG_LEN + TXT_LEN
    bound = 1.0 / jnp.sqrt(jnp.float32(fan_in))
    kw, kb = jax.random.split(key)
    # Stored transposed relative to PyTorch's (out, in): here (in, out).
    w_t = jax.random.uniform(kw, (fan_in, N_CLASSES), jnp.float32, -bound, bound)
    b = jax.random.uniform(kb, (N_CLASSES,), jnp.float32, -bound, bound)
    return w_t, b


if __name__ == "__main__":
    key = jax.random.PRNGKey(0)
    k_img, k_txt, k_param = jax.random.split(key, 3)

    B = 2
    inp_img = jax.random.normal(k_img, (B, IMG_LEN), jnp.float32)
    inp_txt = jax.random.normal(k_txt, (B, TXT_LEN), jnp.float32)
    w_t, b = init_params(k_param)
    w_img, w_txt, b_pad = prepare_params(w_t, b)

    out = extreme_trivial_forward(inp_img, inp_txt, w_img, w_txt, b_pad)
    out = jax.block_until_ready(out)

    # Sanity check against a pure-JAX f32 reference (bf16 matmul -> looser tol).
    x = jnp.concatenate([inp_img, inp_txt], axis=1)
    ref = jax.nn.log_softmax(x @ w_t + b, axis=1)
    assert out.shape == (B, N_CLASSES)
    assert bool(jnp.all(jnp.isfinite(out)))
    assert jnp.allclose(out, ref, atol=5e-2, rtol=5e-2)

    print("KERNEL_OK")
</pallas_src>

<mosaic_0001>
module attributes {stable_mosaic.version = 11 : i64} {
  func.func @_fc_logsoftmax_kernel(%arg0: i32, %arg1: memref<2x1024xf32, #tpu.memory_space<vmem>>, %arg2: memref<2x300xf32, #tpu.memory_space<vmem>>, %arg3: memref<1024x128xbf16, #tpu.memory_space<vmem>>, %arg4: memref<300x128xbf16, #tpu.memory_space<vmem>>, %arg5: memref<1x128xf32, #tpu.memory_space<vmem>>, %arg6: memref<2x128xf32, #tpu.memory_space<vmem>>) attributes {dimension_semantics = [#tpu.dimension_semantics<parallel>], iteration_bounds = array<i64: 1>, scalar_prefetch = 0 : i64, scratch_operands = 0 : i64, tpu.core_type = #tpu.core_type<tc>, window_params = [{transform_indices = @transform_0, window_bounds = array<i64: 2, 1024>}, {transform_indices = @transform_1, window_bounds = array<i64: 2, 300>}, {pipeline_mode = #tpu.pipeline_mode<synchronous>, transform_indices = @transform_2, window_bounds = array<i64: 1024, 128>}, {pipeline_mode = #tpu.pipeline_mode<synchronous>, transform_indices = @transform_3, window_bounds = array<i64: 300, 128>}, {pipeline_mode = #tpu.pipeline_mode<synchronous>, transform_indices = @transform_4, window_bounds = array<i64: 1, 128>}, {transform_indices = @transform_5, window_bounds = array<i64: 2, 128>}]} {
    %c0 = arith.constant 0 : index
    %c0_0 = arith.constant 0 : index
    %0 = vector.load %arg1[%c0, %c0_0] : memref<2x1024xf32, #tpu.memory_space<vmem>>, vector<2x1024xf32>
    %1 = arith.truncf %0 : vector<2x1024xf32> to vector<2x1024xbf16>
    %c0_1 = arith.constant 0 : index
    %c0_2 = arith.constant 0 : index
    %2 = vector.load %arg2[%c0_1, %c0_2] : memref<2x300xf32, #tpu.memory_space<vmem>>, vector<2x300xf32>
    %3 = arith.truncf %2 : vector<2x300xf32> to vector<2x300xbf16>
    %c0_3 = arith.constant 0 : index
    %c0_4 = arith.constant 0 : index
    %4 = vector.load %arg3[%c0_3, %c0_4] : memref<1024x128xbf16, #tpu.memory_space<vmem>>, vector<1024x128xbf16>
    %cst = arith.constant dense<0.000000e+00> : vector<2x128xf32>
    %5 = tpu.matmul %1, %4, %cst {dimension_numbers = #tpu.dot_dimension_numbers<[1], [0], [0], [1], [0, 0, 1, 1], [], []>} : vector<2x1024xbf16>, vector<1024x128xbf16>, vector<2x128xf32> -> vector<2x128xf32>
    %c0_5 = arith.constant 0 : index
    %c0_6 = arith.constant 0 : index
    %6 = vector.load %arg4[%c0_5, %c0_6] : memref<300x128xbf16, #tpu.memory_space<vmem>>, vector<300x128xbf16>
    %cst_7 = arith.constant dense<0.000000e+00> : vector<2x128xf32>
    %7 = tpu.matmul %3, %6, %cst_7 {dimension_numbers = #tpu.dot_dimension_numbers<[1], [0], [0], [1], [0, 0, 1, 1], [], []>} : vector<2x300xbf16>, vector<300x128xbf16>, vector<2x128xf32> -> vector<2x128xf32>
    %8 = arith.addf %5, %7 : vector<2x128xf32>
    %c0_8 = arith.constant 0 : index
    %c0_9 = arith.constant 0 : index
    %9 = vector.load %arg5[%c0_8, %c0_9] : memref<1x128xf32, #tpu.memory_space<vmem>>, vector<1x128xf32>
    %10 = vector.broadcast %9 : vector<1x128xf32> to vector<2x128xf32>
    %11 = arith.addf %8, %10 : vector<2x128xf32>
    %cst_10 = arith.constant dense<0xFF800000> : vector<2xf32>
    %12 = vector.multi_reduction <maximumf>, %11, %cst_10 [1] : vector<2x128xf32> to vector<2xf32>
    %13 = vector.shape_cast %12 : vector<2xf32> to vector<2x1xf32>
    %14 = vector.broadcast %13 : vector<2x1xf32> to vector<2x128xf32>
    %15 = arith.subf %11, %14 : vector<2x128xf32>
    %16 = math.exp %15 : vector<2x128xf32>
    %cst_11 = arith.constant dense<0.000000e+00> : vector<2xf32>
    %17 = vector.multi_reduction <add>, %16, %cst_11 [1] : vector<2x128xf32> to vector<2xf32>
    %18 = vector.shape_cast %17 : vector<2xf32> to vector<2x1xf32>
    %19 = math.log %18 : vector<2x1xf32>
    %20 = vector.broadcast %19 : vector<2x1xf32> to vector<2x128xf32>
    %21 = arith.subf %15, %20 : vector<2x128xf32>
    %c0_12 = arith.constant 0 : index
    %c0_13 = arith.constant 0 : index
    %22 = vector.load %arg6[%c0_12, %c0_13] : memref<2x128xf32, #tpu.memory_space<vmem>>, vector<2x128xf32>
    tpu.vector_store %arg6[%c0_12, %c0_13], %21 {strides = array<i32>} : memref<2x128xf32, #tpu.memory_space<vmem>>, vector<2x128xf32>,
    return
  }
  func.func @transform_0(%arg0: i32) -> (i32, i32) {
    %c0_i32 = arith.constant 0 : i32
    %c0_i32_0 = arith.constant 0 : i32
    return %arg0, %c0_i32 : i32, i32
  }
  func.func @transform_1(%arg0: i32) -> (i32, i32) {
    %c0_i32 = arith.constant 0 : i32
    %c0_i32_0 = arith.constant 0 : i32
    return %arg0, %c0_i32 : i32, i32
  }
  func.func @transform_2(%arg0: i32) -> (i32, i32) {
    %c0_i32 = arith.constant 0 : i32
    %c0_i32_0 = arith.constant 0 : i32
    %c0_i32_1 = arith.constant 0 : i32
    return %c0_i32, %c0_i32_0 : i32, i32
  }
  func.func @transform_3(%arg0: i32) -> (i32, i32) {
    %c0_i32 = arith.constant 0 : i32
    %c0_i32_0 = arith.constant 0 : i32
    %c0_i32_1 = arith.constant 0 : i32
    return %c0_i32, %c0_i32_0 : i32, i32
  }
  func.func @transform_4(%arg0: i32) -> (i32, i32) {
    %c0_i32 = arith.constant 0 : i32
    %c0_i32_0 = arith.constant 0 : i32
    %c0_i32_1 = arith.constant 0 : i32
    return %c0_i32, %c0_i32_0 : i32, i32
  }
  func.func @transform_5(%arg0: i32) -> (i32, i32) {
    %c0_i32 = arith.constant 0 : i32
    %c0_i32_0 = arith.constant 0 : i32
    return %arg0, %c0_i32 : i32, i32
  }
}

</mosaic_0001>

<bundles_post_ra>
// kernel: tpu_custom_call.1
= control target key start
LH: loop header
LB: loop body
LE: loop exit
PB: predicated region body
PF: predicated region fallthrough
CT: control target
= control target key end

     0   :  { %10 = vsyncpa [#allocation3], 0  ;;  %s1639_s0 = inlined_call_operand.hbm [shape: f32[2,1024], index: 0, kind: input, shape index: {}]   ;;  %s1640_s1 = inlined_call_operand.hbm [shape: f32[2,300], index: 1, kind: input, shape index: {}]   ;;  %s1641_s2 = inlined_call_operand.hbm [shape: bf16[1024,128], index: 2, kind: input, shape index: {}]   ;;  %s1642_s3 = inlined_call_operand.hbm [shape: bf16[300,128], index: 3, kind: input, shape index: {}]   ;;  %s1643_s4 = inlined_call_operand.vmem [shape: f32[1,128], index: 4, kind: input, shape index: {}]   ;;  %s1644_s5 = inlined_call_operand.hbm [shape: f32[2,128], index: 5, kind: output, shape index: {}]  }
   0x1   :  { %11 = vsyncpa [#allocation6], 0 }
   0x2   :  { %12 = vsyncpa [#allocation9], 0 }
   0x3   :  { %13 = vsyncpa [#allocation4], 0  ;;  %s1528_s18 = smov [#allocation5]   ;;  %s1529_s20 = smov [#allocation2]  }
   0x4   :  { %s30_s19 = sshll.u32 %s1528_s18, 4  ;;  %s20_s21 = sshll.u32 %s1529_s20, 4  ;;  %s31_s19 = int_to_ptr.vmem [resolvable:$true] %s30_s19  ;;  %s21_s21 = int_to_ptr.vmem [resolvable:$true] %s20_s21 }
   0x5   :  { %s1410_s24 = scalar_lea.hbm %s1640_s1, 96 }
   0x6   :  { %p1411_p0 = scmp.ne.s32.totalorder %s1640_s1, %s1410_s24  ;;  %p1414_p1 = scmp.lt.u32.totalorder %s1410_s24, %s1640_s1 }
   0x8   :  { %p1416_p2 = pnand %p1414_p1, %p1411_p0 }
   0xa   :  { %1419 = shalt.err (!%p1416_p2)
}
   0xb   :  { %s1420_s29 = scalar_lea.vmem %s31_s19, 96  ;;  %p1425_p4 = scmp.lt.s32.totalorder %s31_s19, %s31_s19 }
   0xc   :  { %p1421_p3 = scmp.ne.s32.totalorder %s31_s19, %s1420_s29  ;;  %p1426_p5 = scmp.lt.s32.totalorder %s1420_s29, %s1420_s29 }
   0xe   :  { %p1427_p6 = por %p1426_p5, %p1425_p4 }
  0x10   :  { %p1428_p7 = pnand %p1427_p6, %p1421_p3 }
  0x12   :  { %1431 = shalt.err (!%p1428_p7)
}
  0x13   :  { %33 = dma.hbm_to_vmem [thread:$0]  %s1640_s1, 96, %s31_s19, [#allocation6]  }
  0x14   :  { %s1432_s9 = scalar_lea.hbm %s1639_s0, 256 }
  0x15   :  { %p1433_p8 = scmp.ne.s32.totalorder %s1639_s0, %s1432_s9  ;;  %p1436_p9 = scmp.lt.u32.totalorder %s1432_s9, %s1639_s0 }
  0x17   :  { %p1438_p10 = pnand %p1436_p9, %p1433_p8 }
  0x19   :  { %1441 = shalt.err (!%p1438_p10)
}
  0x1a   :  { %s1442_s14 = scalar_lea.vmem %s21_s21, 256  ;;  %p1447_p12 = scmp.lt.s32.totalorder %s21_s21, %s21_s21 }
  0x1b   :  { %p1443_p11 = scmp.ne.s32.totalorder %s21_s21, %s1442_s14  ;;  %p1448_p13 = scmp.lt.s32.totalorder %s1442_s14, %s1442_s14 }
  0x1d   :  { %p1449_p0 = por %p1448_p13, %p1447_p12 }
  0x1f   :  { %p1450_p1 = pnand %p1449_p0, %p1443_p11 }
  0x21   :  { %1453 = shalt.err (!%p1450_p1)
}
  0x22   :  { %23 = dma.hbm_to_vmem [thread:$0]  %s1639_s0, 256, %s21_s21, [#allocation3]  }
  0x23   :  { %s1530_s16 = smov [#allocation7]   ;;  %s1454_s20 = scalar_lea.hbm %s1641_s2, 8192 }
  0x24   :  { %s39_s17 = sshll.u32 %s1530_s16, 4  ;;  %p1455_p2 = scmp.ne.s32.totalorder %s1641_s2, %s1454_s20  ;;  %s40_s17 = int_to_ptr.vmem [resolvable:$true] %s39_s17 }
  0x25   :  { %p1458_p3 = scmp.lt.u32.totalorder %s1454_s20, %s1641_s2 }
  0x27   :  { %p1460_p4 = pnand %p1458_p3, %p1455_p2 }
  0x29   :  { %1463 = shalt.err (!%p1460_p4)
}
  0x2a   :  { %s1464_s26 = scalar_lea.vmem %s40_s17, 8192  ;;  %p1469_p6 = scmp.lt.s32.totalorder %s40_s17, %s40_s17 }
  0x2b   :  { %p1465_p5 = scmp.ne.s32.totalorder %s40_s17, %s1464_s26  ;;  %p1470_p7 = scmp.lt.s32.totalorder %s1464_s26, %s1464_s26 }
  0x2d   :  { %p1471_p8 = por %p1470_p7, %p1469_p6 }
  0x2f   :  { %p1472_p9 = pnand %p1471_p8, %p1465_p5 }
  0x31   :  { %1475 = shalt.err (!%p1472_p9)
}
  0x32   :  { %s1531_s0 = smov 64   ;;  %s1532_s21 = smov 4  }
  0x33   :  { %45 = dma.hbm_to_vmem [thread:$0]  %s1641_s2, 8192, %s40_s17, [#allocation6], %s1531_s0, %s1531_s0, %s1532_s21  }
  0x34   :  { %s1533_s29 = smov [#allocation8]   ;;  %s1476_s8 = scalar_lea.hbm %s1642_s3, 2432 }
  0x35   :  { %s51_s30 = sshll.u32 %s1533_s29, 4  ;;  %p1477_p10 = scmp.ne.s32.totalorder %s1642_s3, %s1476_s8  ;;  %s52_s30 = int_to_ptr.vmem [resolvable:$true] %s51_s30 }
  0x36   :  { %p1480_p11 = scmp.lt.u32.totalorder %s1476_s8, %s1642_s3 }
  0x38   :  { %p1482_p12 = pnand %p1480_p11, %p1477_p10 }
  0x3a   :  { %1485 = shalt.err (!%p1482_p12)
}
  0x3b   :  { %s1486_s13 = scalar_lea.vmem %s52_s30, 2432  ;;  %p1491_p0 = scmp.lt.s32.totalorder %s52_s30, %s52_s30 }
  0x3c   :  { %p1487_p13 = scmp.ne.s32.totalorder %s52_s30, %s1486_s13  ;;  %p1492_p1 = scmp.lt.s32.totalorder %s1486_s13, %s1486_s13 }
  0x3e   :  { %p1493_p2 = por %p1492_p1, %p1491_p0 }
  0x40   :  { %p1494_p3 = pnand %p1493_p2, %p1487_p13 }
  0x42   :  { %1497 = shalt.err (!%p1494_p3)
}
  0x43   :  { %57 = dma.hbm_to_vmem [thread:$0]  %s1642_s3, 2432, %s52_s30, [#allocation9], %s1531_s0, %s1531_s0, %s1532_s21  }
  0x44   :  { %1520 = dma.done.wait [#allocation3], 256  }
  0x45   :  { %1521 = vsyncadd [#allocation3], 4294967040 }
  0x46   :  { %1522 = dma.done.wait [#allocation6], 8288  }
  0x47   :  { %1523 = vsyncadd [#allocation6], 4294959008 }
  0x48   :  { %1524 = dma.done.wait [#allocation9], 2432  }
  0x49   :  { %1525 = vsyncadd [#allocation9], 4294964864  ;;  %v1534_v0 = vmov 0.0   ;;  %vm1535_vm0 = vmmov 0   ;;  %v1320_v1 = vld [vmem:[#allocation8 + $0x40] sm:$0xff]   ;;  %v81_v6 = vlaneseq  ;;  %v1323_v7 = vld [vmem:[#allocation8 + $0x48] sm:$0xff]  }
  0x4a   :  { %1300 = vmatprep.subr.bf16.mxu1 %v1534_v0  ;;  %1306 = vmatprep.mubr.msk.bf16.mxu1 %vm1535_vm0, %v1534_v0  ;;  %v1321_v2 = vld [vmem:[#allocation8 + $0x80] sm:$0xff]   ;;  %v1536_v4 = vmov 1983009808   ;;  %v1324_v8 = vld [vmem:[#allocation8 + $0x88] sm:$0xff]   ;;  %vm434_vm1 = vcmask 1045504   ;;  %v1326_v10 = vld [vmem:[#allocation8 + $0x50] sm:$0xff]  }
  0x4b   :  { %1186 = vmatprep.subr.bf16.mxu0 %v1320_v1  ;;  %v1322_v3 = vld [vmem:[#allocation8] sm:$0xff]   ;;  %v79_v5 = vunpack.c.l.s4 %v1536_v4  ;;  %1301 = vmatpush3.bf16.msra.mxu1 %v1321_v2  ;;  %v1325_v9 = vld [vmem:[#allocation8 + $0x8] sm:$0xff]   ;;  %v82_v12 = vshrl.u32 %v81_v6, 7  ;;  %v1327_v13 = vld [vmem:[#allocation8 + $0x90] sm:$0x3f]   ;;  %vm430_vm2 = vcmask 359424  }
  0x4c   :  { %1187 = vmatpush3.bf16.msra.mxu0 %v1322_v3  ;;  %1302 = vmatprep.subr.bf16.mxu1 %v1534_v0  ;;  %v1328_v14 = vld [vmem:[#allocation8 + $0x10] sm:$0xff]   ;;  %v436_v15 = vsel %vm434_vm1, %v1327_v13, 0  ;;  %v1329_v16 = vld [vmem:[#allocation7 + $0x40] sm:$0xff]   ;;  %v1330_v17 = vld [vmem:[#allocation8 + $0x58] sm:$0xff]   ;;  %vm1070_vm3 = vcmask 1041408   ;;  %s1537_s15 = smov [#allocation10]  }
  0x4d   :  { %1188 = vmatprep.subr.bf16.mxu0 %v1323_v7  ;;  %v80_v11 = vunpack.c.0.s8 %v79_v5  ;;  %v127_v19 = vld [vmem:[#allocation5] sm:$0x3f]  ;;  %v1332_v24 = vld [vmem:[#allocation7] sm:$0xff]   ;;  %v1334_v28 = vld [vmem:[#allocation7 + $0x48] sm:$0xff]   ;;  %s1090_s16 = sshll.u32 %s1537_s15, 4  ;;  %s1091_s16 = int_to_ptr.vmem [resolvable:$true] %s1090_s16 }
  0x4e   :  { %v129_v20 = vcombine.high %v127_v19, %v127_v19  ;;  %v1333_v22 = vld [vmem:[#allocation8 + $0x18] sm:$0xff]   ;;  %v1335_v26 = vld [vmem:[#allocation8 + $0x60] sm:$0xff]   ;;  %v1336_v31 = vld [vmem:[#allocation7 + $0x8] sm:$0xff]   ;;  %p1503_p5 = scmp.lt.s32.totalorder %s1091_s16, %s1091_s16 }
  0x4f   :  { %1303 = vmatpush3.bf16.msra.mxu1 %v1324_v8  ;;  %v1616_v18 = vsub.s32 %v80_v11, %v82_v12  ;;  %v1337_v30 = vld [vmem:[#allocation8 + $0x20] sm:$0xff]   ;;  %v1339_v32 = vld [vmem:[#allocation8 + $0x68] sm:$0xff]   ;;  %v1338_v33 = vld [vmem:[#allocation7 + $0x50] sm:$0xff]  }
  0x50   :  { %1189 = vmatpush3.bf16.msra.mxu0 %v1325_v9  ;;  %1304 = vmatprep.subr.bf16.mxu1 %v1534_v0  ;;  %v1341_v34 = vld [vmem:[#allocation8 + $0x28] sm:$0xff]   ;;  %v1340_v35 = vld [vmem:[#allocation7 + $0x10] sm:$0xff]   ;;  %v1342_v37 = vld [vmem:[#allocation7 + $0x58] sm:$0xff]  }
  0x51   :  { %1190 = vmatprep.subr.bf16.mxu0 %v1326_v10  ;;  %v136_v21 = vrot.slane %v127_v19, %v1616_v18  ;;  %v143_v23 = vrot.slane %v129_v20, %v1616_v18  ;;  %v1343_v36 = vld [vmem:[#allocation8 + $0x70] sm:$0xff]   ;;  %v1344_v39 = vld [vmem:[#allocation7 + $0x18] sm:$0xff]   ;;  %v1346_v41 = vld [vmem:[#allocation7 + $0x60] sm:$0xff]  }
  0x52   :  { %v1345_v38 = vld [vmem:[#allocation8 + $0x30] sm:$0xff]   ;;  %v1347_v40 = vld [vmem:[#allocation8 + $0x78] sm:$0xff]   ;;  %v1348_v43 = vld [vmem:[#allocation7 + $0x20] sm:$0xff]  }
  0x53   :  { %1305 = vmatpush3.bf16.msra.mxu1 %v436_v15  ;;  %v144_v25 = vcombine.high %v136_v21, %v136_v21  ;;  %v150_v27 = vpack.c.bf16 %v143_v23, %v143_v23  ;;  %v1349_v42 = vld [vmem:[#allocation8 + $0x38] sm:$0xff]   ;;  %v1350_v44 = vld [vmem:[#allocation7 + $0x68] sm:$0xff]   ;;  %v148_v45 = vpack.c.bf16 %v136_v21, %v136_v21  ;;  %v1352_v46 = vld [vmem:[#allocation7 + $0xc0] sm:$0xff]  }
  0x54   :  { %1191 = vmatpush3.bf16.msra.mxu0 %v1328_v14  ;;  %1212 = vmatprep.subr.bf16.mxu1 %v1329_v16  ;;  %v1353_v47 = vld [vmem:[#allocation7 + $0x80] sm:$0xff]   ;;  %v1351_v48 = vld [vmem:[#allocation7 + $0x28] sm:$0xff]   ;;  %v1354_v49 = vld [vmem:[#allocation7 + $0x70] sm:$0xff]  }
  0x55   :  { %1192 = vmatprep.subr.bf16.mxu0 %v1330_v17  ;;  %v149_v29 = vpack.c.bf16 %v144_v25, %v144_v25  ;;  %v1356_v50 = vld [vmem:[#allocation7 + $0xc8] sm:$0xff]   ;;  %v1355_v52 = vld [vmem:[#allocation7 + $0x30] sm:$0xff]   ;;  %v1358_v53 = vld [vmem:[#allocation7 + $0x78] sm:$0xff]  }
  0x56   :  { %1307 = vmatmul.mubr.msk.bf16.vlgmr.msra.gmra.mrb[0].mxu1 %vm430_vm2, %v150_v27  ;;  %v1357_v51 = vld [vmem:[#allocation7 + $0x88] sm:$0xff]   ;;  %v1360_v54 = vld [vmem:[#allocation7 + $0xd0] sm:$0xff]   ;;  %v1359_v57 = vld [vmem:[#allocation7 + $0x38] sm:$0xff]  }
  0x57   :  { %470 = vmatprep.mubr.bf16.mxu0 %v149_v29  ;;  %1213 = vmatpush3.bf16.msra.mxu1 %v1332_v24  ;;  %v1361_v55 = vld [vmem:[#allocation7 + $0x90] sm:$0xff]   ;;  %v1363_v60 = vld [vmem:[#allocation7 + $0xd8] sm:$0xff]   ;;  %v1362_v62 = vld [vmem:[#allocation7 + $0x140] sm:$0xff]  }
  0x58   :  { %1193 = vmatpush3.bf16.msra.mxu0 %v1333_v22  ;;  %1214 = vmatprep.subr.bf16.mxu1 %v1334_v28  ;;  %v73_v56 = vld [vmem:[#allocation2] sm:$0xff]  ;;  %v1365_v0 = vld [vmem:[#allocation7 + $0x98] sm:$0xff]   ;;  %v1364_v3 = vld [vmem:[#allocation7 + $0x100] sm:$0xff]  }
  0x59   :  { %1194 = vmatprep.subr.bf16.mxu0 %v1335_v26  ;;  %v84_v58 = vrot.slane %v73_v56, %v1616_v18  ;;  %v77_v59 = vcombine.high %v73_v56, %v73_v56  ;;  %v1367_v5 = vld [vmem:[#allocation7 + $0xe0] sm:$0xff]   ;;  %v1366_v6 = vld [vmem:[#allocation7 + $0x148] sm:$0xff]   ;;  %v1370_v11 = vld [vmem:[#allocation7 + $0x150] sm:$0xff]  }
  0x5a   :  { %v1369_v8 = vld [vmem:[#allocation7 + $0xa0] sm:$0xff]   ;;  %v1368_v9 = vld [vmem:[#allocation7 + $0x108] sm:$0xff]   ;;  %v1372_v13 = vld [vmem:[#allocation7 + $0x110] sm:$0xff]  }
  0x5b   :  { %1215 = vmatpush3.bf16.msra.mxu1 %v1336_v31  ;;  %v92_v61 = vcombine.high %v84_v58, %v84_v58  ;;  %v91_v63 = vrot.slane %v77_v59, %v1616_v18  ;;  %v119_v2 = vpack.c.bf16 %v84_v58, %v84_v58  ;;  %v1371_v10 = vld [vmem:[#allocation7 + $0xe8] sm:$0xff]   ;;  %v1375_v14 = vld [vmem:[#allocation7 + $0xf0] sm:$0xff]   ;;  %v1374_v15 = vld [vmem:[#allocation7 + $0x158] sm:$0xff]  }
  0x5c   :  { %1195 = vmatpush3.bf16.msra.mxu0 %v1337_v30  ;;  %1216 = vmatprep.subr.bf16.mxu1 %v1338_v33  ;;  %v1373_v12 = vld [vmem:[#allocation7 + $0xa8] sm:$0xff]   ;;  %v1377_v16 = vld [vmem:[#allocation7 + $0xb0] sm:$0xff]   ;;  %v1376_v17 = vld [vmem:[#allocation7 + $0x118] sm:$0xff]  }
  0x5d   :  { %1196 = vmatprep.subr.bf16.mxu0 %v1339_v32  ;;  %v120_v1 = vpack.c.bf16 %v92_v61, %v92_v61  ;;  %v93_v4 = vcombine.high %v91_v63, %v91_v63  ;;  %v1379_v19 = vld [vmem:[#allocation7 + $0xf8] sm:$0xff]   ;;  %v1378_v20 = vld [vmem:[#allocation7 + $0x160] sm:$0xff]   ;;  %v1383_v23 = vld [vmem:[#allocation7 + $0x168] sm:$0xff]   ;;  %v121_v24 = vpack.c.bf16 %v91_v63, %v91_v63 }
  0x5e   :  { %v1381_v21 = vld [vmem:[#allocation7 + $0xb8] sm:$0xff]   ;;  %v1380_v22 = vld [vmem:[#allocation7 + $0x120] sm:$0xff]   ;;  %v1384_v27 = vld [vmem:[#allocation7 + $0x128] sm:$0xff]  }
  0x5f   :  { %1217 = vmatpush3.bf16.msra.mxu1 %v1340_v35  ;;  %934 = vmatprep.mubr.bf16.mxu1 %v120_v1  ;;  %v122_v7 = vpack.c.bf16 %v93_v4, %v93_v4  ;;  %v1385_v25 = vld [vmem:[#allocation7 + $0x1c0] sm:$0xff]   ;;  %v1387_v28 = vld [vmem:[#allocation7 + $0x170] sm:$0xff]   ;;  %v1389_v29 = vld [vmem:[#allocation7 + $0x1c8] sm:$0xff]  }
  0x60   :  { %1197 = vmatpush3.bf16.msra.mxu0 %v1341_v34  ;;  %1218 = vmatprep.subr.bf16.mxu1 %v1342_v37  ;;  %v1386_v26 = vld [vmem:[#allocation7 + $0x180] sm:$0xff]   ;;  %v1390_v30 = vld [vmem:[#allocation7 + $0x188] sm:$0xff]   ;;  %v1388_v31 = vld [vmem:[#allocation7 + $0x130] sm:$0xff]  }
  0x61   :  { %1198 = vmatprep.subr.bf16.mxu0 %v1343_v36  ;;  %v1391_v32 = vld [vmem:[#allocation7 + $0x178] sm:$0xff]   ;;  %v1393_v33 = vld [vmem:[#allocation7 + $0x1d0] sm:$0xff]  }
  0x62   :  { %v1394_v34 = vld [vmem:[#allocation7 + $0x190] sm:$0xff]   ;;  %v1395_v37 = vld [vmem:[#allocation7 + $0x1d8] sm:$0xff]  }
  0x63   :  { %1219 = vmatpush3.bf16.msra.mxu1 %v1344_v39  ;;  %v74_v35 = vld [vmem:[#allocation2 + $0x8] sm:$0xff] }
  0x64   :  { %1199 = vmatpush3.bf16.msra.mxu0 %v1345_v38  ;;  %1220 = vmatprep.subr.bf16.mxu1 %v1346_v41  ;;  %v101_v36 = vrot.slane %v74_v35, %v1616_v18  ;;  %v94_v38 = vcombine.high %v74_v35, %v74_v35  ;;  %v1392_v39 = vld [vmem:[#allocation7 + $0x138] sm:$0xff]  }
  0x65   :  { %1200 = vmatprep.subr.bf16.mxu0 %v1347_v40 }
  0x66   :  { %v109_v40 = vcombine.high %v101_v36, %v101_v36  ;;  %v108_v41 = vrot.slane %v94_v38, %v1616_v18  ;;  %v1401_v18 = vld [vmem:[#allocation7 + $0x1f0] sm:$0xff]  }
  0x67   :  { %1221 = vmatpush3.bf16.msra.mxu1 %v1348_v43 }
  0x68   :  { %1201 = vmatpush3.bf16.msra.mxu0 %v1349_v42  ;;  %1222 = vmatprep.subr.bf16.mxu1 %v1350_v44  ;;  %v1396_v42 = vld [vmem:[#allocation7 + $0x198] sm:$0xff]   ;;  %v124_v43 = vpack.c.bf16 %v109_v40, %v109_v40  ;;  %v123_v44 = vpack.c.bf16 %v101_v36, %v101_v36 }
  0x69   :  { %1234 = vmatprep.subr.bf16.mxu0 %v1352_v46  ;;  %v110_v46 = vcombine.high %v108_v41, %v108_v41 }
  0x6b   :  { %471 = vmatmul.mubr.bf16.vlgmr.msra.gmra.mrb[0].mxu0 %v148_v45  ;;  %1223 = vmatpush3.bf16.msra.mxu1 %v1351_v48  ;;  %v1397_v45 = vld [vmem:[#allocation7 + $0x1e0] sm:$0xff]  }
  0x6c   :  { %1235 = vmatpush3.bf16.msra.mxu0 %v1353_v47  ;;  %1224 = vmatprep.subr.bf16.mxu1 %v1354_v49  ;;  %v126_v47 = vpack.c.bf16 %v110_v46, %v110_v46  ;;  %v1398_v48 = vld [vmem:[#allocation7 + $0x1a0] sm:$0xff]   ;;  %v1399_v49 = vld [vmem:[#allocation7 + $0x1e8] sm:$0xff]  }
  0x6d   :  { %1236 = vmatprep.subr.bf16.mxu0 %v1356_v50  ;;  %974 = vmatprep.mubr.bf16.mxu0 %v122_v7  ;;  %v1400_v50 = vld [vmem:[#allocation7 + $0x1a8] sm:$0xff]  }
  0x6f   :  { %1225 = vmatpush3.bf16.msra.mxu1 %v1355_v52  ;;  %v1403_v52 = vld [vmem:[#allocation7 + $0x1f8] sm:$0xff]  }
  0x70   :  { %1237 = vmatpush3.bf16.msra.mxu0 %v1357_v51  ;;  %1226 = vmatprep.subr.bf16.mxu1 %v1358_v53  ;;  %v1402_v51 = vld [vmem:[#allocation7 + $0x1b0] sm:$0xff]   ;;  %v1404_v53 = vld [vmem:[#allocation7 + $0x1b8] sm:$0xff]  }
  0x71   :  { %1238 = vmatprep.subr.bf16.mxu0 %v1360_v54  ;;  %v125_v54 = vpack.c.bf16 %v108_v41, %v108_v41 }
  0x73   :  { %1227 = vmatpush3.bf16.msra.mxu1 %v1359_v57 }
  0x74   :  { %1239 = vmatpush3.bf16.msra.mxu0 %v1361_v55  ;;  %1256 = vmatprep.subr.bf16.mxu1 %v1362_v62 }
  0x75   :  { %1240 = vmatprep.subr.bf16.mxu0 %v1363_v60 }
  0x76   :  { %935 = vmatmul.mubr.bf16.vlgmr.msra.gmra.mrb[4].mxu1 %v119_v2 }
  0x77   :  { %1257 = vmatpush3.bf16.msra.mxu1 %v1364_v3  ;;  %1014 = vmatprep.mubr.bf16.mxu1 %v124_v43 }
  0x78   :  { %1241 = vmatpush3.bf16.msra.mxu0 %v1365_v0  ;;  %1258 = vmatprep.subr.bf16.mxu1 %v1366_v6 }
  0x79   :  { %1242 = vmatprep.subr.bf16.mxu0 %v1367_v5 }
  0x7b   :  { %1259 = vmatpush3.bf16.msra.mxu1 %v1368_v9 }
  0x7c   :  { %1243 = vmatpush3.bf16.msra.mxu0 %v1369_v8  ;;  %1260 = vmatprep.subr.bf16.mxu1 %v1370_v11 }
  0x7d   :  { %1244 = vmatprep.subr.bf16.mxu0 %v1371_v10 }
  0x7f   :  { %1261 = vmatpush3.bf16.msra.mxu1 %v1372_v13 }
  0x80   :  { %1245 = vmatpush3.bf16.msra.mxu0 %v1373_v12  ;;  %1262 = vmatprep.subr.bf16.mxu1 %v1374_v15 }
  0x81   :  { %1246 = vmatprep.subr.bf16.mxu0 %v1375_v14 }
  0x83   :  { %1263 = vmatpush3.bf16.msra.mxu1 %v1376_v17 }
  0x84   :  { %1247 = vmatpush3.bf16.msra.mxu0 %v1377_v16  ;;  %1264 = vmatprep.subr.bf16.mxu1 %v1378_v20 }
  0x85   :  { %1248 = vmatprep.subr.bf16.mxu0 %v1379_v19 }
  0x87   :  { %1265 = vmatpush3.bf16.msra.mxu1 %v1380_v22 }
  0x88   :  { %1249 = vmatpush3.bf16.msra.mxu0 %v1381_v21  ;;  %1266 = vmatprep.subr.bf16.mxu1 %v1383_v23 }
  0x89   :  { %1278 = vmatprep.subr.bf16.mxu0 %v1385_v25  ;;  %v1185_v25 = vld [vmem:[%s1643_s4] ss:$0 sm:$0xff]  ;;  %s1498_s4 = scalar_lea.vmem %s1091_s16, 32 }
  0x8a   :  { %p1499_p4 = scmp.ne.s32.totalorder %s1091_s16, %s1498_s4  ;;  %p1504_p6 = scmp.lt.s32.totalorder %s1498_s4, %s1498_s4 }
  0x8b   :  { %975 = vmatmul.mubr.bf16.vlgmr.msra.gmra.mrb[4].mxu0 %v121_v24  ;;  %1267 = vmatpush3.bf16.msra.mxu1 %v1384_v27 }
  0x8c   :  { %1279 = vmatpush3.bf16.msra.mxu0 %v1386_v26  ;;  %1268 = vmatprep.subr.bf16.mxu1 %v1387_v28  ;;  %p1505_p7 = por %p1504_p6, %p1503_p5 }
  0x8d   :  { %1280 = vmatprep.subr.bf16.mxu0 %v1389_v29  ;;  %1054 = vmatprep.mubr.bf16.mxu0 %v126_v47 }
  0x8e   :  { %p1506_p8 = pnand %p1505_p7, %p1499_p4 }
  0x8f   :  { %1269 = vmatpush3.bf16.msra.mxu1 %v1388_v31 }
  0x90   :  { %1281 = vmatpush3.bf16.msra.mxu0 %v1390_v30  ;;  %1270 = vmatprep.subr.bf16.mxu1 %v1391_v32 }
  0x91   :  { %1282 = vmatprep.subr.bf16.mxu0 %v1393_v33 }
  0x93   :  { %1271 = vmatpush3.bf16.msra.mxu1 %v1392_v39 }
  0x94   :  { %1283 = vmatpush3.bf16.msra.mxu0 %v1394_v34 }
  0x95   :  { %1284 = vmatprep.subr.bf16.mxu0 %v1395_v37 }
  0x96   :  { %1015 = vmatmul.mubr.bf16.vlgmr.msra.gmra.mrb[8].mxu1 %v123_v44 }
  0x98   :  { %1285 = vmatpush3.bf16.msra.mxu0 %v1396_v42 }
  0x99   :  { %1286 = vmatprep.subr.bf16.mxu0 %v1397_v45 }
  0x9c   :  { %1287 = vmatpush3.bf16.msra.mxu0 %v1398_v48 }
  0x9d   :  { %1288 = vmatprep.subr.bf16.mxu0 %v1399_v49 }
  0xa0   :  { %1289 = vmatpush3.bf16.msra.mxu0 %v1400_v50 }
  0xa1   :  { %1290 = vmatprep.subr.bf16.mxu0 %v1401_v18 }
  0xa4   :  { %1291 = vmatpush3.bf16.msra.mxu0 %v1402_v51 }
  0xa5   :  { %1292 = vmatprep.subr.bf16.mxu0 %v1403_v52 }
  0xa8   :  { %1293 = vmatpush3.bf16.msra.mxu0 %v1404_v53 }
  0xab   :  { %1055 = vmatmul.mubr.bf16.vlgmr.msra.gmra.mrb[8].mxu0 %v125_v54 }
 0x129   :  { %v512_v55 = vpop.f32.mrb[0].mxu1 }
 0x12a   :  { %v1308_v56 = vpop.f32.mrb[1].mxu1 }
 0x12b   :  { %v515_v57 = vpop.f32.mrb[2].mxu1 }
 0x12c   :  { %v1309_v58 = vpop.f32.mrb[3].mxu1 }
 0x13e   :  { %v1202_v59 = vpop.f32.mrb[0].mxu0 }
 0x13f   :  { %v1203_v60 = vpop.f32.mrb[1].mxu0 }
 0x140   :  { %v1204_v61 = vadd.f32 %v1203_v60, %v1202_v59  ;;  %v1205_v62 = vpop.f32.mrb[2].mxu0 }
 0x141   :  { %v1206_v63 = vpop.f32.mrb[3].mxu0 }
 0x142   :  { %v513_v0 = vadd.f32 %v1204_v61, %v512_v55 }
 0x149   :  { %v1228_v1 = vpop.f32.mrb[4].mxu1 }
 0x14a   :  { %v1229_v2 = vpop.f32.mrb[5].mxu1 }
 0x14b   :  { %v1230_v3 = vadd.f32 %v1229_v2, %v1228_v1  ;;  %v1231_v4 = vpop.f32.mrb[6].mxu1 }
 0x14c   :  { %v1232_v5 = vpop.f32.mrb[7].mxu1 }
 0x14d   :  { %v937_v6 = vadd.f32 %v1230_v3, %v513_v0 }
 0x15e   :  { %v1250_v7 = vpop.f32.mrb[4].mxu0 }
 0x15f   :  { %v1251_v8 = vpop.f32.mrb[5].mxu0 }
 0x160   :  { %v1252_v9 = vadd.f32 %v1251_v8, %v1250_v7  ;;  %v1253_v10 = vpop.f32.mrb[6].mxu0 }
 0x161   :  { %v1254_v11 = vpop.f32.mrb[7].mxu0 }
 0x162   :  { %v977_v12 = vadd.f32 %v1252_v9, %v937_v6 }
 0x169   :  { %v1272_v13 = vpop.f32.mrb[8].mxu1 }
 0x16a   :  { %v1273_v14 = vpop.f32.mrb[9].mxu1 }
 0x16b   :  { %v1274_v15 = vadd.f32 %v1273_v14, %v1272_v13  ;;  %v1275_v16 = vpop.f32.mrb[10].mxu1 }
 0x16c   :  { %v1276_v17 = vpop.f32.mrb[11].mxu1 }
 0x16d   :  { %v1017_v19 = vadd.f32 %v1274_v15, %v977_v12 }
 0x17e   :  { %v1294_v20 = vpop.f32.mrb[8].mxu0 }
 0x17f   :  { %v1295_v21 = vpop.f32.mrb[9].mxu0 }
 0x180   :  { %v1296_v22 = vadd.f32 %v1295_v21, %v1294_v20  ;;  %v1297_v23 = vpop.f32.mrb[10].mxu0 }
 0x181   :  { %v1298_v24 = vpop.f32.mrb[11].mxu0 }
 0x182   :  { %v1057_v26 = vadd.f32 %v1296_v22, %v1017_v19 }
 0x184   :  { %v1069_v27 = vadd.f32 %v1185_v25, %v1057_v26 }
 0x186   :  { %v1071_v28 = vsel %vm1070_vm3, %v1069_v27, -inf }
 0x187   :  { %1072 = vmax.xlane.f32.xlu0 %v1071_v28 }
 0x214   :  { %v1073_v29 = vpop.xlane.xlu0 %1072 }
 0x215   :  { %v1074_v30 = vsub.f32 %v1069_v27, %v1073_v29 }
 0x217   :  { %v1075_v31 = vmul.f32 1.442695, %v1074_v30 }
 0x219   :  { %1406 = vpow2.f32 %v1075_v31 }
 0x223   :  { %v1407_v32 = vpop.eup %1406 }
 0x224   :  { %v1077_v33 = vsel %vm1070_vm3, %v1407_v32, 0.0 }
 0x225   :  { %1078 = vadd.xlane.f32.xlu0 %v1077_v33 }
 0x2b2   :  { %v1079_v34 = vpop.xlane.xlu0 %1078 }
 0x2b3   :  { %1408 = vlog2.f32 %v1079_v34 }
 0x2bd   :  { %v1409_v35 = vpop.eup %1408 }
 0x2be   :  { %v1081_v36 = vmul.f32 0.6931472, %v1409_v35 }
 0x2c0   :  { %v1082_v37 = vsub.f32 %v1074_v30, %v1081_v36 }
 0x2c2   :  { %1083 = vst [vmem:[#allocation10] sm:$0x3] %v1082_v37 }
 0x2c3   :  { %1509 = shalt.err (!%p1506_p8)
}
 0x2c4   :  { %s1510_s19 = scalar_lea.hbm %s1644_s5, 32 }
 0x2c5   :  { %p1511_p9 = scmp.ne.s32.totalorder %s1644_s5, %s1510_s19  ;;  %p1514_p10 = scmp.lt.u32.totalorder %s1510_s19, %s1644_s5 }
 0x2c7   :  { %p1516_p11 = pnand %p1514_p10, %p1511_p9 }
 0x2c9   :  { %1519 = shalt.err (!%p1516_p11)
}
 0x2ca   :  { %1093 = dma.vmem_to_hbm [thread:$0]  %s1091_s16, 32, %s1644_s5, [#allocation4]  }
 0x2cb   :  { %1526 = dma.done.wait [#allocation4], 32  }
 0x2cc   :  { %1527 = vsyncadd [#allocation4], 4294967264 }
 0x2cd   :  { %1097 = vsyncpa [#allocation3], 1 }
 0x2ce   :  { %1098 = vsyncpa [#allocation6], 1 }
 0x2cf   :  { %1099 = vsyncpa [#allocation9], 1 }
 0x2d0   :  { %1100 = vsyncpa [#allocation4], 1 }

</bundles_post_ra>
